<compile_context>
chip_gen: v6e
topology: v6e:2x2x1
jax: 0.10.0
libtpu: 0.0.40
codegen_flags: <defaults>
</compile_context>

<pallas_src>
import functools

import jax
import jax.numpy as jnp
from jax.experimental import pallas as pl
from jax.experimental.pallas import tpu as pltpu

_LANES = 128
_TM = 512  # row tile for the large-M path (multiple of 8; ~85% of HBM roofline)


def _conv1x1_sigmoid_kernel(x_ref, w_ref, b_ref, o_ref):
    # x_ref: (tm, Cin)  w_ref: (Cin, Cout_p)  b_ref: (1, Cout_p)  o_ref: (tm, Cout_p)
    acc = jnp.dot(x_ref[...], w_ref[...], preferred_element_type=jnp.float32)
    # jax.nn.sigmoid lowers to the EUP (exp + recip) path, off the VALU slot.
    o_ref[...] = jax.nn.sigmoid(acc + b_ref[...]).astype(o_ref.dtype)


def prepare_params(weight, bias):
    """One-time repack: weight (Cout, Cin, 1, 1) -> (Cin, Cout_p); bias -> (1, Cout_p).

    Cout is padded up to a multiple of 128 so kernel output stores are
    lane-dense.  Returns (w_mat, b_mat, true_cout)."""
    Cout, Cin = weight.shape[0], weight.shape[1]
    Cout_p = ((Cout + _LANES - 1) // _LANES) * _LANES
    w_mat = jnp.asarray(weight).reshape(Cout, Cin).T      # (Cin, Cout)
    b_mat = jnp.asarray(bias).reshape(1, Cout)
    if Cout_p != Cout:
        w_mat = jnp.pad(w_mat, ((0, 0), (0, Cout_p - Cout)))
        b_mat = jnp.pad(b_mat, ((0, 0), (0, Cout_p - Cout)))
    return w_mat, b_mat, Cout


@functools.partial(jax.jit, static_argnames=("cout",))
def conv1x1_sigmoid(x_nchw, w_mat, b_mat, cout):
    """x_nchw: (N, Cin, H, W); w_mat: (Cin, Cout_p); b_mat: (1, Cout_p)."""
    N, Cin, H, W = x_nchw.shape
    Cout_p = w_mat.shape[1]
    M = N * H * W

    if H == 1 and W == 1:
        # H=W=1: NCHW -> (N, Cin) is a pure reshape (no transpose kernel).
        x_mat = x_nchw.reshape(M, Cin)
    else:
        x_mat = jnp.transpose(x_nchw, (0, 2, 3, 1)).reshape(M, Cin)

    if M <= _TM:
        # Tiny problem (the module's actual size): single block resident in
        # VMEM, no grid / software-pipeline machinery, no fixed per-step cost.
        out_p = pl.pallas_call(
            _conv1x1_sigmoid_kernel,
            out_shape=jax.ShapeDtypeStruct((M, Cout_p), x_nchw.dtype),
            in_specs=[
                pl.BlockSpec(memory_space=pltpu.MemorySpace.VMEM),
                pl.BlockSpec(memory_space=pltpu.MemorySpace.VMEM),
                pl.BlockSpec(memory_space=pltpu.MemorySpace.VMEM),
            ],
            out_specs=pl.BlockSpec(memory_space=pltpu.MemorySpace.VMEM),
        )(x_mat, w_mat, b_mat)
    else:
        # Generalized path: tile rows with a 'parallel' grid (megacore / v7x
        # friendly); weight + bias stay resident across the grid.
        M_p = ((M + _TM - 1) // _TM) * _TM
        x_use = jnp.pad(x_mat, ((0, M_p - M), (0, 0))) if M_p != M else x_mat
        out_p = pl.pallas_call(
            _conv1x1_sigmoid_kernel,
            out_shape=jax.ShapeDtypeStruct((M_p, Cout_p), x_nchw.dtype),
            grid_spec=pltpu.PrefetchScalarGridSpec(
                num_scalar_prefetch=0,
                grid=(M_p // _TM,),
                in_specs=[
                    pl.BlockSpec((_TM, Cin), lambda i: (i, 0)),
                    pl.BlockSpec((Cin, Cout_p), lambda i: (0, 0)),
                    pl.BlockSpec((1, Cout_p), lambda i: (0, 0)),
                ],
                out_specs=pl.BlockSpec((_TM, Cout_p), lambda i: (i, 0)),
            ),
            compiler_params=pltpu.CompilerParams(
                dimension_semantics=("parallel",)),
        )(x_use, w_mat, b_mat)
        out_p = out_p[:M]

    out_mat = out_p[:, :cout]
    if H == 1 and W == 1:
        return out_mat.reshape(N, cout, 1, 1)
    return out_mat.reshape(N, H, W, cout).transpose(0, 3, 1, 2)


if __name__ == "__main__":
    key = jax.random.PRNGKey(0)
    k_x, k_w, k_b, k_x2 = jax.random.split(key, 4)

    N, Cin, H, W = 1, 34, 1, 1
    Cout = 816

    # Deterministic synthetic parameters matching Conv2d(34, 816, 1).
    x = jax.random.normal(k_x, (N, Cin, H, W), dtype=jnp.float32)
    weight = jax.random.normal(k_w, (Cout, Cin, 1, 1), dtype=jnp.float32) * 0.1
    bias = jax.random.normal(k_b, (Cout,), dtype=jnp.float32) * 0.1

    # Parameters repacked + padded once (init-time), not on the per-call path.
    w_mat, b_mat, true_cout = prepare_params(weight, bias)

    # --- module-accurate shape: small single-block path ---
    out = conv1x1_sigmoid(x, w_mat, b_mat, cout=true_cout)
    jax.block_until_ready(out)
    ref = jax.nn.sigmoid(
        jnp.einsum("nchw,oc->nohw", x, weight.reshape(Cout, Cin),
                   precision=jax.lax.Precision.HIGHEST)
        + bias.reshape(1, Cout, 1, 1)
    )
    assert out.shape == (N, Cout, H, W), out.shape
    assert jnp.allclose(out, ref, atol=1e-4, rtol=1e-4), "mismatch (small path)"

    # --- exercise the generalized tiled path (M = N*H*W > tile) ---
    H2 = W2 = 32
    x2 = jax.random.normal(k_x2, (N, Cin, H2, W2), dtype=jnp.float32)
    out2 = conv1x1_sigmoid(x2, w_mat, b_mat, cout=true_cout)
    jax.block_until_ready(out2)
    ref2 = jax.nn.sigmoid(
        jnp.einsum("nchw,oc->nohw", x2, weight.reshape(Cout, Cin),
                   precision=jax.lax.Precision.HIGHEST)
        + bias.reshape(1, Cout, 1, 1)
    )
    assert out2.shape == (N, Cout, H2, W2), out2.shape
    assert jnp.allclose(out2, ref2, atol=1e-4, rtol=1e-4), "mismatch (tiled path)"

    print("KERNEL_OK")
</pallas_src>

<mosaic_0001>
module attributes {stable_mosaic.version = 11 : i64} {
  func.func @_conv1x1_sigmoid_kernel(%arg0: memref<1x34xf32, #tpu.memory_space<vmem>>, %arg1: memref<34x896xf32, #tpu.memory_space<vmem>>, %arg2: memref<1x896xf32, #tpu.memory_space<vmem>>, %arg3: memref<1x896xf32, #tpu.memory_space<vmem>>) attributes {dimension_semantics = [], scalar_prefetch = 0 : i64, scratch_operands = 0 : i64, tpu.core_type = #tpu.core_type<tc>} {
    %c0 = arith.constant 0 : index
    %c0_0 = arith.constant 0 : index
    %0 = vector.load %arg0[%c0, %c0_0] : memref<1x34xf32, #tpu.memory_space<vmem>>, vector<1x34xf32>
    %c0_1 = arith.constant 0 : index
    %c0_2 = arith.constant 0 : index
    %1 = vector.load %arg1[%c0_1, %c0_2] : memref<34x896xf32, #tpu.memory_space<vmem>>, vector<34x896xf32>
    %cst = arith.constant dense<0.000000e+00> : vector<1x896xf32>
    %2 = tpu.matmul %0, %1, %cst {dimension_numbers = #tpu.dot_dimension_numbers<[1], [0], [0], [1], [0, 0, 1, 1], [], []>} : vector<1x34xf32>, vector<34x896xf32>, vector<1x896xf32> -> vector<1x896xf32>
    %c0_3 = arith.constant 0 : index
    %c0_4 = arith.constant 0 : index
    %3 = vector.load %arg2[%c0_3, %c0_4] : memref<1x896xf32, #tpu.memory_space<vmem>>, vector<1x896xf32>
    %4 = arith.addf %2, %3 : vector<1x896xf32>
    %5 = arith.negf %4 : vector<1x896xf32>
    %6 = math.exp %5 : vector<1x896xf32>
    %cst_5 = arith.constant 1.000000e+00 : f32
    %7 = vector.broadcast %cst_5 : f32 to vector<1x896xf32>
    %8 = arith.addf %7, %6 : vector<1x896xf32>
    %9 = arith.divf %7, %8 : vector<1x896xf32>
    %c0_6 = arith.constant 0 : index
    %c0_7 = arith.constant 0 : index
    %10 = vector.load %arg3[%c0_6, %c0_7] : memref<1x896xf32, #tpu.memory_space<vmem>>, vector<1x896xf32>
    tpu.vector_store %arg3[%c0_6, %c0_7], %9 {strides = array<i32>} : memref<1x896xf32, #tpu.memory_space<vmem>>, vector<1x896xf32>,
    return
  }
}

</mosaic_0001>

<bundles_post_ra>
// kernel: conv1x1_sigmoid.1
= control target key start
LH: loop header
LB: loop body
LE: loop exit
PB: predicated region body
PF: predicated region fallthrough
CT: control target
= control target key end

     0   :  { %8 = vsyncpa [#allocation3], 0  ;;  %s718_s0 = inlined_call_operand.vmem [shape: f32[1,34], index: 0, kind: input, shape index: {}]   ;;  %s719_s1 = inlined_call_operand.hbm [shape: f32[34,896], index: 1, kind: input, shape index: {}]   ;;  %s720_s2 = inlined_call_operand.hbm [shape: f32[1,896], index: 2, kind: input, shape index: {}]   ;;  %s721_s3 = inlined_call_operand.vmem [shape: f32[1,896], index: 3, kind: output, shape index: {}]  }
   0x1   :  { %9 = vsyncpa [#allocation5], 0  ;;  %s647_s12 = smov [#allocation2]  }
   0x2   :  { %s17_s13 = sshll.u32 %s647_s12, 4  ;;  %s18_s13 = int_to_ptr.vmem [resolvable:$true] %s17_s13 }
   0x3   :  { %s611_s14 = scalar_lea.vmem %s18_s13, 4480  ;;  %p616_p1 = scmp.lt.s32.totalorder %s18_s13, %s18_s13 }
   0x4   :  { %p612_p0 = scmp.ne.s32.totalorder %s18_s13, %s611_s14  ;;  %p617_p2 = scmp.lt.s32.totalorder %s611_s14, %s611_s14 }
   0x6   :  { %p618_p3 = por %p617_p2, %p616_p1 }
   0x8   :  { %p619_p4 = pnand %p618_p3, %p612_p0 }
   0xa   :  { %622 = shalt.err (!%p619_p4)
}
   0xb   :  { %s648_s15 = smov 896   ;;  %s649_s16 = smov 56  }
   0xc   :  { %23 = dma.hbm_to_vmem [thread:$0]  %s719_s1, 4480, %s18_s13, [#allocation3], %s648_s15, %s648_s15, %s649_s16  }
   0xd   :  { %s650_s19 = smov [#allocation4]  }
   0xe   :  { %s30_s20 = sshll.u32 %s650_s19, 4  ;;  %s31_s20 = int_to_ptr.vmem [resolvable:$true] %s30_s20 }
   0xf   :  { %s631_s21 = scalar_lea.vmem %s31_s20, 112  ;;  %s635_s22 = scalar_lea.vmem %s31_s20, 128 }
  0x10   :  { %p632_p5 = scmp.ne.s32.totalorder %s31_s20, %s631_s21  ;;  %p636_p6 = scmp.lt.s32.totalorder %s31_s20, %s31_s20 }
  0x11   :  { %p637_p7 = scmp.lt.s32.totalorder %s635_s22, %s631_s21 }
  0x13   :  { %p638_p8 = por %p637_p7, %p636_p6 }
  0x15   :  { %p639_p9 = pnand %p638_p8, %p632_p5 }
  0x17   :  { %642 = shalt.err (!%p639_p9)
}
  0x18   :  { %33 = dma.hbm_to_vmem [thread:$0]  %s720_s2, 112, %s31_s20, [#allocation5]  }
  0x19   :  { %643 = dma.done.wait [#allocation3], 4480  }
  0x1a   :  { %644 = vsyncadd [#allocation3], 4294962816 }
  0x1b   :  { %645 = dma.done.wait [#allocation5], 112  }
  0x1c   :  { %646 = vsyncadd [#allocation5], 4294967184  ;;  %v651_v0 = vmov 0.0   ;;  %vm117_vm0 = vcmask 1041408   ;;  %v70_v1 = vld [vmem:[#allocation2 + $0xe8] sm:$0x3]  ;;  %v78_v37 = vlaneseq }
  0x1d   :  { %203 = vmatprep.mubr.f32.mxu0 %v651_v0  ;;  %274 = vmatprep.mubr.f32.mxu1 %v651_v0  ;;  %v72_v2 = vld [vmem:[#allocation2 + $0xf8] sm:$0x3]  ;;  %v69_v3 = vld [vmem:[#allocation2 + $0xe0] sm:$0x3]  ;;  %v71_v4 = vld [vmem:[#allocation2 + $0xf0] sm:$0x3] }
  0x1e   :  { %531 = vmatprep.subr.msk.mxu0 %vm117_vm0, %v70_v1  ;;  %534 = vmatprep.subr.msk.mxu1 %vm117_vm0, %v72_v2  ;;  %v63_v5 = vld [vmem:[#allocation2 + $0xb0] sm:$0xff]  ;;  %v65_v6 = vld [vmem:[#allocation2 + $0xc0] sm:$0xff]  ;;  %v62_v7 = vld [vmem:[#allocation2 + $0xa8] sm:$0xff]  ;;  %vm113_vm1 = vcmask 277504   ;;  %vm652_vm2 = vmmov 0   ;;  %v704_v38 = vshrl.u32 %v78_v37, 7 }
  0x1f   :  { %532 = vmatpush1.msk.msra.mxu0 %vm117_vm0, %v69_v3  ;;  %535 = vmatpush1.msk.msra.mxu1 %vm117_vm0, %v71_v4  ;;  %v64_v8 = vld [vmem:[#allocation2 + $0xb8] sm:$0xff]  ;;  %v58_v10 = vld [vmem:[#allocation2 + $0x88] sm:$0xff]  ;;  %v55_v11 = vld [vmem:[#allocation2 + $0x70] sm:$0xff]  ;;  %vm522_vm3 = vcmp.lt.s32.totalorder %v78_v37, 896 }
  0x20   :  { %v56_v9 = vld [vmem:[#allocation2 + $0x78] sm:$0xff]  ;;  %163 = vmatprep.subr.mxu0 %v63_v5  ;;  %234 = vmatprep.subr.mxu1 %v65_v6  ;;  %v57_v12 = vld [vmem:[#allocation2 + $0x80] sm:$0xff]  ;;  %v51_v14 = vld [vmem:[#allocation2 + $0x50] sm:$0xff]  ;;  %v80_v39 = vsub.s32 0, %v704_v38  ;;  %v88_v40 = vsub.s32 2, %v704_v38  ;;  %v84_v42 = vsub.s32 1, %v704_v38 }
  0x21   :  { %164 = vmatpush1.msra.mxu0 %v62_v7  ;;  %235 = vmatpush1.msra.mxu1 %v64_v8  ;;  %v49_v13 = vld [vmem:[#allocation2 + $0x40] sm:$0xff]  ;;  %v48_v15 = vld [vmem:[#allocation2 + $0x38] sm:$0xff]  ;;  %v50_v16 = vld [vmem:[#allocation2 + $0x48] sm:$0xff]  ;;  %v92_v43 = vsub.s32 3, %v704_v38  ;;  %v96_v58 = vsub.s32 4, %v704_v38  ;;  %v100_v61 = vsub.s32 5, %v704_v38 }
  0x22   :  { %165 = vmatprep.subr.mxu0 %v56_v9  ;;  %236 = vmatprep.subr.mxu1 %v58_v10  ;;  %v42_v17 = vld [vmem:[#allocation2 + $0x8] sm:$0xff]  ;;  %v44_v18 = vld [vmem:[#allocation2 + $0x18] sm:$0xff]  ;;  %v41_v19 = vld [vmem:[#allocation2] sm:$0xff]  ;;  %v104_v62 = vsub.s32 6, %v704_v38 }
  0x23   :  { %166 = vmatpush1.msra.mxu0 %v55_v11  ;;  %237 = vmatpush1.msra.mxu1 %v57_v12  ;;  %v43_v20 = vld [vmem:[#allocation2 + $0x10] sm:$0xff]  ;;  %v40_v21 = vld [vmem:[%s718_s0] sm:$0x1]  ;;  %v74_v22 = vld [vmem:[#allocation2 + $0x108] sm:$0x3] }
  0x24   :  { %167 = vmatprep.subr.mxu0 %v49_v13  ;;  %238 = vmatprep.subr.mxu1 %v51_v14  ;;  %v73_v23 = vld [vmem:[#allocation2 + $0x100] sm:$0x3]  ;;  %v75_v24 = vld [vmem:[#allocation2 + $0x110] sm:$0x3]  ;;  %v66_v26 = vld [vmem:[#allocation2 + $0xc8] sm:$0xff] }
  0x25   :  { %168 = vmatpush1.msra.mxu0 %v48_v15  ;;  %239 = vmatpush1.msra.mxu1 %v50_v16  ;;  %v67_v25 = vld [vmem:[#allocation2 + $0xd0] sm:$0xff]  ;;  %v68_v27 = vld [vmem:[#allocation2 + $0xd8] sm:$0xff]  ;;  %v61_v30 = vld [vmem:[#allocation2 + $0xa0] sm:$0xff] }
  0x26   :  { %169 = vmatprep.subr.mxu0 %v42_v17  ;;  %240 = vmatprep.subr.mxu1 %v44_v18  ;;  %v60_v28 = vld [vmem:[#allocation2 + $0x98] sm:$0xff]  ;;  %v59_v29 = vld [vmem:[#allocation2 + $0x90] sm:$0xff]  ;;  %v53_v31 = vld [vmem:[#allocation2 + $0x60] sm:$0xff] }
  0x27   :  { %170 = vmatpush1.msra.mxu0 %v41_v19  ;;  %241 = vmatpush1.msra.mxu1 %v43_v20  ;;  %v52_v32 = vld [vmem:[#allocation2 + $0x58] sm:$0xff]  ;;  %v46_v33 = vld [vmem:[#allocation2 + $0x28] sm:$0xff]  ;;  %v45_v35 = vld [vmem:[#allocation2 + $0x20] sm:$0xff] }
  0x28   :  { %533 = vmatmul.mubr.msk.f32.vlgmr.msra.gmra.mxu0 %vm113_vm1, %v40_v21  ;;  %536 = vmatmul.mubr.msk.f32.vlgmr.msra.gmra.mxu1 %vm113_vm1, %v40_v21  ;;  %v54_v34 = vld [vmem:[#allocation2 + $0x68] sm:$0xff]  ;;  %v47_v36 = vld [vmem:[#allocation2 + $0x30] sm:$0xff]  ;;  %v76_v41 = vld [vmem:[#allocation4] sm:$0xff] }
  0x29   :  { %537 = vmatprep.subr.msk.mxu0 %vm117_vm0, %v74_v22  ;;  %555 = vmatprep.subr.mxu1 %v651_v0  ;;  %v81_v44 = vrot.slane %v76_v41, %v80_v39  ;;  %v89_v45 = vrot.slane %v76_v41, %v88_v40  ;;  %v85_v46 = vrot.slane %v76_v41, %v84_v42 }
  0x2a   :  { %538 = vmatpush1.msk.msra.mxu0 %vm117_vm0, %v73_v23  ;;  %556 = vmatpush3.msk.msra.mxu1 %vm117_vm0, %v75_v24  ;;  %v93_v47 = vrot.slane %v76_v41, %v92_v43  ;;  %v97_v63 = vrot.slane %v76_v41, %v96_v58  ;;  %v105_v1 = vrot.slane %v76_v41, %v104_v62 }
  0x2b   :  { %305 = vmatprep.subr.mxu0 %v67_v25  ;;  %557 = vmatprep.subr.mxu1 %v651_v0 }
  0x2c   :  { %306 = vmatpush1.msra.mxu0 %v66_v26  ;;  %558 = vmatpush3.msra.mxu1 %v68_v27  ;;  %v653_v26 = vmov 1966171168  }
  0x2d   :  { %307 = vmatprep.subr.mxu0 %v60_v28  ;;  %559 = vmatprep.subr.mxu1 %v651_v0  ;;  %v475_v27 = vunpack.c.l.s4 %v653_v26 }
  0x2e   :  { %308 = vmatpush1.msra.mxu0 %v59_v29  ;;  %560 = vmatpush3.msra.mxu1 %v61_v30 }
  0x2f   :  { %309 = vmatprep.subr.mxu0 %v53_v31  ;;  %561 = vmatprep.subr.mxu1 %v651_v0  ;;  %v476_v31 = vunpack.c.0.s8 %v475_v27 }
  0x30   :  { %310 = vmatpush1.msra.mxu0 %v52_v32  ;;  %345 = vmatprep.mubr.f32.mxu0 %v651_v0 }
  0x31   :  { %311 = vmatprep.subr.mxu0 %v46_v33  ;;  %562 = vmatpush3.msra.mxu1 %v54_v34  ;;  %v479_v34 = vsub.s32 %v476_v31, %v704_v38 }
  0x32   :  { %312 = vmatpush1.msra.mxu0 %v45_v35  ;;  %563 = vmatprep.subr.mxu1 %v651_v0 }
  0x33   :  { %539 = vmatmul.mubr.msk.f32.vlgmr.msra.gmra.mxu0 %vm113_vm1, %v40_v21  ;;  %564 = vmatpush3.msra.mxu1 %v47_v36 }
  0x34   :  { %565 = vmatprep.mubr.msk.f32.mxu1 %vm652_vm2, %v651_v0  ;;  %v101_v0 = vrot.slane %v76_v41, %v100_v61 }
  0x35   :  { %566 = vmatmul.mubr.msk.f32.vlgmr.msra.gmra.mxu1 %vm113_vm1, %v40_v21 }
  0xe8   :  { %v205_v48 = vpop.f32.mrf.mxu0  ;;  %v276_v49 = vpop.f32.mrf.mxu1 }
  0xe9   :  { %v206_v50 = vadd.f32 %v205_v48, %v81_v44  ;;  %v277_v51 = vadd.f32 %v276_v49, %v89_v45 }
  0xea   :  { %v207_v52 = vpop.f32.mrf.mxu0  ;;  %v278_v53 = vpop.f32.mrf.mxu1 }
  0xeb   :  { %v542_v54 = vmul.f32 -1.442695, %v206_v50  ;;  %v544_v55 = vmul.f32 -1.442695, %v277_v51  ;;  %v208_v56 = vadd.f32 %v207_v52, %v85_v46  ;;  %v279_v57 = vadd.f32 %v278_v53, %v93_v47 }
  0xed   :  { %575 = vpow2.f32 %v542_v54  ;;  %v543_v59 = vmul.f32 -1.442695, %v208_v56  ;;  %v545_v60 = vmul.f32 -1.442695, %v279_v57 }
  0xee   :  { %577 = vpow2.f32 %v544_v55 }
  0xef   :  { %579 = vpow2.f32 %v543_v59 }
  0xf0   :  { %581 = vpow2.f32 %v545_v60 }
  0xf3   :  { %v347_v2 = vpop.f32.mrf.mxu0 }
  0xf4   :  { %v348_v3 = vadd.f32 %v347_v2, %v97_v63 }
  0xf5   :  { %v349_v4 = vpop.f32.mrf.mxu0  ;;  %v418_v5 = vpop.f32.mrf.mxu1 }
  0xf6   :  { %v546_v6 = vmul.f32 -1.442695, %v348_v3  ;;  %v350_v7 = vadd.f32 %v349_v4, %v101_v0  ;;  %v419_v8 = vadd.f32 %v418_v5, %v105_v1 }
  0xf7   :  { %v567_v9 = vpop.f32.mrf.mxu1 }
  0xf8   :  { %583 = vpow2.f32 %v546_v6  ;;  %v547_v10 = vmul.f32 -1.442695, %v350_v7  ;;  %v548_v11 = vmul.f32 -1.442695, %v419_v8 }
  0xfa   :  { %v576_v12 = vpop.eup %575  ;;  %585 = vpow2.f32 %v547_v10 }
  0xfb   :  { %v578_v13 = vpop.eup %577  ;;  %v443_v14 = vadd.f32 1.0, %v576_v12  ;;  %587 = vpow2.f32 %v548_v11 }
  0xfc   :  { %v580_v15 = vpop.eup %579  ;;  %v445_v16 = vadd.f32 1.0, %v578_v13 }
  0xfd   :  { %v582_v17 = vpop.eup %581  ;;  %v444_v18 = vadd.f32 1.0, %v580_v15  ;;  %589 = vrcp.f32 %v443_v14 }
  0xfe   :  { %v446_v19 = vadd.f32 1.0, %v582_v17  ;;  %591 = vrcp.f32 %v445_v16 }
  0xff   :  { %593 = vrcp.f32 %v444_v18 }
 0x100   :  { %595 = vrcp.f32 %v446_v19 }
 0x105   :  { %v584_v20 = vpop.eup %583 }
 0x106   :  { %v447_v21 = vadd.f32 1.0, %v584_v20 }
 0x107   :  { %v586_v22 = vpop.eup %585 }
 0x108   :  { %v588_v23 = vpop.eup %587  ;;  %v448_v24 = vadd.f32 1.0, %v586_v22  ;;  %597 = vrcp.f32 %v447_v21 }
 0x109   :  { %v449_v25 = vadd.f32 1.0, %v588_v23 }
 0x10a   :  { %599 = vrcp.f32 %v448_v24  ;;  %v590_v28 = vpop.eup %589 }
 0x10b   :  { %601 = vrcp.f32 %v449_v25  ;;  %v592_v29 = vpop.eup %591 }
 0x10c   :  { %v594_v30 = vpop.eup %593 }
 0x10d   :  { %v596_v32 = vpop.eup %595  ;;  %v471_v33 = vcombine.low %v590_v28, %v594_v30 }
 0x10e   :  { %v472_v35 = vcombine.low %v592_v29, %v596_v32 }
 0x10f   :  { %v480_v39 = vrot.slane %v471_v33, %v479_v34 }
 0x110   :  { %v487_v40 = vrot.slane %v472_v35, %v479_v34 }
 0x112   :  { %v502_v45 = vcombine.low %v480_v39, %v487_v40 }
 0x114   :  { %v510_v48 = vrot.slane %v502_v45, %v479_v34 }
 0x115   :  { %v598_v36 = vpop.eup %597 }
 0x117   :  { %v600_v41 = vpop.eup %599 }
 0x118   :  { %v602_v42 = vpop.eup %601  ;;  %v473_v43 = vcombine.low %v598_v36, %v600_v41 }
 0x119   :  { %v501_v44 = vrot.slane %v602_v42, %v479_v34 }
 0x11a   :  { %v494_v46 = vrot.slane %v473_v43, %v479_v34 }
 0x11c   :  { %v503_v47 = vcombine.low %v494_v46, %v501_v44 }
 0x11e   :  { %v517_v49 = vrot.slane %v503_v47, %v479_v34 }
 0x120   :  { %v518_v50 = vcombine.low %v510_v48, %v517_v49 }
 0x122   :  { %524 = vst.msk [vmem:[%s721_s3] sm:$0x7f] %vm522_vm3, %v518_v50 }
 0x123   :  { %529 = vsyncpa [#allocation3], 1 }
 0x124   :  { %530 = vsyncpa [#allocation5], 1 }

</bundles_post_ra>
